<compile_context>
chip_gen: v7x
topology: tpu7x:2x2x1
jax: 0.10.0
libtpu: 0.0.40
codegen_flags: <defaults>
</compile_context>

<pallas_src>
import jax
import jax.numpy as jnp
from jax import lax
from jax.experimental import pallas as pl
from jax.experimental.pallas import tpu as pltpu


_SUBLANE = 8
_LANE = 128
_TARGET_BLOCK_BYTES = 2 * 1024 * 1024  # ~2 MiB per block


def _make_kernel(C, D, channel_axis, row_block, col_block):
    """Build the elementwise kernel for one dense 2-D channel view.

    channel_axis == 0: view is (B*C, D),  channel id = global_row % C
    channel_axis == 1: view is (B, C*D),  channel id = global_col // D
    """

    def kernel(x_ref, o_ref):
        # Compute in f32; cast once on the final (dense, unmasked) store.
        x = x_ref[...].astype(jnp.float32)
        tanh_out = jnp.tanh(x)
        if C == 1:
            out = tanh_out
        else:
            if channel_axis == 0:
                base = pl.program_id(0) * row_block
                idx = base + lax.broadcasted_iota(jnp.int32, x.shape, 0)
                ch = idx % C
            else:
                base = pl.program_id(1) * col_block
                idx = base + lax.broadcasted_iota(jnp.int32, x.shape, 1)
                ch = idx // D
            if C == 2:
                # torch: out[:, 1] = clamp(x[:, 1], 0, 1) only when C == 2
                out = jnp.where(ch == 0, tanh_out, jnp.clip(x, 0.0, 1.0))
            else:
                # channels >= 1 stay zero (zeros_like init in torch)
                out = jnp.where(ch == 0, tanh_out, 0.0)
        o_ref[...] = out.astype(o_ref.dtype)

    return kernel


def _pick_blocks(R, Dd, itemsize):
    """Pick a (row_block, col_block) that is legal and ~_TARGET_BLOCK_BYTES."""
    # Lane (last) dim: whole extent when moderate, else a 128-multiple slice.
    if Dd <= 4096:
        col_block = Dd                       # == full dim -> always legal
    else:
        col_block = 4096                     # multiple of 128
    # Sublane (second-to-last) dim: as many rows as fit the byte budget.
    max_rows = max(
        _SUBLANE,
        (_TARGET_BLOCK_BYTES // max(1, col_block * itemsize))
        // _SUBLANE * _SUBLANE,
    )
    if R <= max_rows:
        row_block = R                        # == full dim -> always legal
    else:
        row_block = max_rows                 # multiple of 8
    # Keep at least 2 grid steps when there is enough work (v7x has 2 TCs).
    if (pl.cdiv(R, row_block) * pl.cdiv(Dd, col_block)) < 2 and R > 2 * _SUBLANE:
        row_block = max(_SUBLANE, ((R // 2) // _SUBLANE) * _SUBLANE)
    return row_block, col_block


def custom_act(x: jax.Array) -> jax.Array:
    """Pallas TPU implementation of CustomAct.forward. Same shape/dtype as x."""
    if x.ndim < 2:
        raise ValueError("CustomAct expects input with at least 2 dims (B, C, ...)")
    orig_shape = x.shape
    B, C = int(x.shape[0]), int(x.shape[1])
    D = 1
    for s in x.shape[2:]:
        D *= int(s)

    # Free (contiguous) reshape into a dense 2-D view: last dim -> lanes,
    # second-to-last -> sublanes, so loads/stores are dense 8x128 vregs.
    if x.ndim > 2 and D >= _LANE:
        view = x.reshape(B * C, D)           # channels interleaved along rows
        channel_axis = 0
    else:
        view = x.reshape(B, C * D)           # channels laid out along lanes
        channel_axis = 1

    R, Dd = view.shape
    row_block, col_block = _pick_blocks(R, Dd, view.dtype.itemsize)
    grid = (pl.cdiv(R, row_block), pl.cdiv(Dd, col_block))

    kernel = _make_kernel(C, D, channel_axis, row_block, col_block)
    out2d = pl.pallas_call(
        kernel,
        out_shape=jax.ShapeDtypeStruct((R, Dd), x.dtype),
        grid=grid,
        in_specs=[pl.BlockSpec((row_block, col_block), lambda i, j: (i, j))],
        out_specs=pl.BlockSpec((row_block, col_block), lambda i, j: (i, j)),
        compiler_params=pltpu.CompilerParams(
            dimension_semantics=("parallel", "parallel")),
    )(view)
    return out2d.reshape(orig_shape)


def custom_act_ref(x: jax.Array) -> jax.Array:
    """Pure-JAX reference mirroring the PyTorch forward."""
    out = jnp.zeros_like(x)
    out = out.at[:, 0].set(jnp.tanh(x[:, 0]))
    if x.shape[1] == 2:
        out = out.at[:, 1].set(jnp.clip(x[:, 1], 0.0, 1.0))
    return out


if __name__ == "__main__":
    key = jax.random.PRNGKey(0)
    k1, k2, k3, k4 = jax.random.split(key, 4)

    tests = [
        ("C=2 4D f32", jax.random.normal(k1, (4, 2, 16, 16), dtype=jnp.float32), 1e-6),
        ("C=4 4D f32", jax.random.normal(k2, (2, 4, 16, 16), dtype=jnp.float32), 1e-6),
        ("C=2 2D f32", jax.random.normal(k3, (16, 2), dtype=jnp.float32), 1e-6),
        ("C=2 3D bf16", jax.random.normal(k4, (8, 2, 128), dtype=jnp.bfloat16), 2e-2),
    ]

    for name, x, tol in tests:
        y = jax.block_until_ready(custom_act(x))
        y_ref = custom_act_ref(x.astype(jnp.float32)).astype(x.dtype)
        assert y.shape == x.shape and y.dtype == x.dtype, f"shape/dtype: {name}"
        assert jnp.allclose(
            y.astype(jnp.float32), y_ref.astype(jnp.float32), atol=tol, rtol=tol
        ), f"mismatch vs reference: {name}"

    print("KERNEL_OK")
</pallas_src>

<mosaic_0001>
module attributes {stable_mosaic.version = 11 : i64} {
  func.func @kernel(%arg0: i32, %arg1: i32, %arg2: memref<8x256xf32, #tpu.memory_space<vmem>>, %arg3: memref<8x256xf32, #tpu.memory_space<vmem>>) attributes {dimension_semantics = [#tpu.dimension_semantics<parallel>, #tpu.dimension_semantics<parallel>], iteration_bounds = array<i64: 1, 1>, scalar_prefetch = 0 : i64, scratch_operands = 0 : i64, tpu.core_type = #tpu.core_type<tc>, window_params = [{transform_indices = @transform_0, window_bounds = array<i64: 8, 256>}, {transform_indices = @transform_1, window_bounds = array<i64: 8, 256>}]} {
    %c0 = arith.constant 0 : index
    %c0_0 = arith.constant 0 : index
    %0 = vector.load %arg2[%c0, %c0_0] : memref<8x256xf32, #tpu.memory_space<vmem>>, vector<8x256xf32>
    %1 = math.tanh %0 : vector<8x256xf32>
    %c8_i32 = arith.constant 8 : i32
    %2 = arith.muli %arg0, %c8_i32 : i32
    %3 = tpu.iota {dimensions = array<i32: 0>} : vector<8x256xi32>
    %4 = vector.broadcast %2 : i32 to vector<8x256xi32>
    %5 = arith.addi %4, %3 : vector<8x256xi32>
    %c2_i32 = arith.constant 2 : i32
    %c0_i32 = arith.constant 0 : i32
    %6 = arith.cmpi eq, %c2_i32, %c0_i32 : i32
    %c1_i32 = arith.constant 1 : i32
    %7 = arith.select %6, %c1_i32, %c2_i32 : i32
    %8 = vector.broadcast %7 : i32 to vector<8x256xi32>
    %9 = arith.remsi %5, %8 : vector<8x256xi32>
    %c0_i32_1 = arith.constant 0 : i32
    %10 = vector.broadcast %c0_i32_1 : i32 to vector<8x256xi32>
    %11 = arith.cmpi ne, %9, %10 : vector<8x256xi32>
    %c0_i32_2 = arith.constant 0 : i32
    %12 = vector.broadcast %c0_i32_2 : i32 to vector<8x256xi32>
    %13 = arith.cmpi slt, %9, %12 : vector<8x256xi32>
    %c0_i32_3 = arith.constant 0 : i32
    %14 = arith.cmpi slt, %7, %c0_i32_3 : i32
    %15 = vector.broadcast %14 : i1 to vector<8x256xi1>
    %16 = vector.broadcast %15 : vector<8x256xi1> to vector<8x256xi1>
    %17 = arith.xori %13, %16 : vector<8x256xi1>
    %18 = arith.andi %17, %11 : vector<8x256xi1>
    %19 = vector.broadcast %7 : i32 to vector<8x256xi32>
    %20 = arith.addi %9, %19 : vector<8x256xi32>
    %21 = arith.select %18, %20, %9 : vector<8x256xi1>, vector<8x256xi32>
    %c0_i32_4 = arith.constant 0 : i32
    %22 = vector.broadcast %c0_i32_4 : i32 to vector<8x256xi32>
    %23 = arith.cmpi eq, %21, %22 : vector<8x256xi32>
    %cst = arith.constant 0.000000e+00 : f32
    %cst_5 = arith.constant 1.000000e+00 : f32
    %24 = vector.broadcast %cst : f32 to vector<8x256xf32>
    %25 = arith.maximumf %24, %0 : vector<8x256xf32>
    %26 = vector.broadcast %cst_5 : f32 to vector<8x256xf32>
    %27 = arith.minimumf %26, %25 : vector<8x256xf32>
    %28 = arith.select %23, %1, %27 : vector<8x256xi1>, vector<8x256xf32>
    %c0_6 = arith.constant 0 : index
    %c0_7 = arith.constant 0 : index
    %29 = vector.load %arg3[%c0_6, %c0_7] : memref<8x256xf32, #tpu.memory_space<vmem>>, vector<8x256xf32>
    tpu.vector_store %arg3[%c0_6, %c0_7], %28 {strides = array<i32>} : memref<8x256xf32, #tpu.memory_space<vmem>>, vector<8x256xf32>,
    return
  }
  func.func @transform_0(%arg0: i32, %arg1: i32) -> (i32, i32) {
    %c0_i32 = arith.constant 0 : i32
    return %arg0, %arg1 : i32, i32
  }
  func.func @transform_1(%arg0: i32, %arg1: i32) -> (i32, i32) {
    %c0_i32 = arith.constant 0 : i32
    return %arg0, %arg1 : i32, i32
  }
}

</mosaic_0001>

<bundles_post_ra>
// kernel: tpu_custom_call.1
= control target key start
LH: loop header
LB: loop body
LE: loop exit
PB: predicated region body
PF: predicated region fallthrough
CT: control target
= control target key end

     0   :  { %6 = vsyncpa [#allocation3], 0  ;;  %s156_s0 = inlined_call_operand.hbm [shape: f32[8,256], index: 0, kind: input, shape index: {}]   ;;  %s157_s1 = inlined_call_operand.hbm [shape: f32[8,256], index: 1, kind: output, shape index: {}]  }
   0x1   :  { %7 = vsyncpa [#allocation4], 0  ;;  %s120_s6 = smov [#allocation2]   ;;  %s72_s10 = scalar_lea.hbm %s156_s0, 256 }
   0x2   :  { %s14_s7 = sshll.u32 %s120_s6, 4  ;;  %p73_p0 = scmp.ne.s32.totalorder %s156_s0, %s72_s10  ;;  %s15_s7 = int_to_ptr.vmem [resolvable:$true] %s14_s7 }
   0x3   :  { %p76_p1 = scmp.lt.u32.totalorder %s72_s10, %s156_s0 }
   0x5   :  { %p78_p2 = pnand %p76_p1, %p73_p0 }
   0x7   :  { %81 = shalt.err (!%p78_p2)
}
   0x8   :  { %s82_s15 = scalar_lea.vmem %s15_s7, 256  ;;  %p87_p4 = scmp.lt.s32.totalorder %s15_s7, %s15_s7 }
   0x9   :  { %p83_p3 = scmp.ne.s32.totalorder %s15_s7, %s82_s15  ;;  %p88_p5 = scmp.lt.s32.totalorder %s82_s15, %s82_s15 }
   0xb   :  { %p89_p6 = por %p88_p5, %p87_p4 }
   0xd   :  { %p90_p7 = pnand %p89_p6, %p83_p3 }
   0xf   :  { %93 = shalt.err (!%p90_p7)
}
  0x10   :  { %17 = dma.hbm_to_vmem [thread:$0]  %s156_s0, 256, %s15_s7, [#allocation3]  }
  0x11   :  { %116 = dma.done.wait [#allocation3], 256  }
  0x12   :  { %117 = vsyncadd [#allocation3], 4294967040  ;;  %v26_v0 = vlaneseq  ;;  %v21_v1 = vld [vmem:[#allocation2] sm:$0xff]  ;;  %v22_v2 = vld [vmem:[#allocation2 + $0x8] sm:$0xff]  ;;  %s121_s18 = smov [#allocation5]  }
  0x13   :  { %68 = vtanh.f32 %v21_v1  ;;  %v43_v4 = vmax.f32 %v21_v1, 0.0  ;;  %v44_v6 = vmax.f32 %v22_v2, 0.0  ;;  %s57_s19 = sshll.u32 %s121_s18, 4  ;;  %s58_s19 = int_to_ptr.vmem [resolvable:$true] %s57_s19 }
  0x14   :  { %v27_v3 = vshrl.u32 %v26_v0, 7  ;;  %70 = vtanh.f32 %v22_v2  ;;  %s94_s0 = scalar_lea.vmem %s58_s19, 256  ;;  %p99_p9 = scmp.lt.s32.totalorder %s58_s19, %s58_s19 }
  0x15   :  { %v45_v7 = vmin.f32 %v43_v4, 1.0  ;;  %v46_v8 = vmin.f32 %v44_v6, 1.0  ;;  %p95_p8 = scmp.ne.s32.totalorder %s58_s19, %s94_s0  ;;  %p100_p10 = scmp.lt.s32.totalorder %s94_s0, %s94_s0 }
  0x16   :  { %v34_v5 = vand.u32 1, %v27_v3 }
  0x17   :  { %p101_p11 = por %p100_p10, %p99_p9 }
  0x18   :  { %vm42_vm0 = vcmp.eq.s32.totalorder %v34_v5, 0 }
  0x19   :  { %p102_p12 = pnand %p101_p11, %p95_p8 }
  0x1d   :  { %v69_v9 = vpop.eup %68 }
  0x1e   :  { %v71_v10 = vpop.eup %70  ;;  %v47_v11 = vsel %vm42_vm0, %v69_v9, %v45_v7 }
  0x1f   :  { %49 = vst [vmem:[#allocation5] sm:$0xff] %v47_v11  ;;  %v48_v12 = vsel %vm42_vm0, %v71_v10, %v46_v8 }
  0x20   :  { %50 = vst [vmem:[#allocation5 + $0x8] sm:$0xff] %v48_v12 }
  0x21   :  { %105 = shalt.err (!%p102_p12)
}
  0x22   :  { %s106_s22 = scalar_lea.hbm %s157_s1, 256 }
  0x23   :  { %p107_p13 = scmp.ne.s32.totalorder %s157_s1, %s106_s22  ;;  %p110_p0 = scmp.lt.u32.totalorder %s106_s22, %s157_s1 }
  0x25   :  { %p112_p1 = pnand %p110_p0, %p107_p13 }
  0x27   :  { %115 = shalt.err (!%p112_p1)
}
  0x28   :  { %60 = dma.vmem_to_hbm [thread:$0]  %s58_s19, 256, %s157_s1, [#allocation4]  }
  0x29   :  { %118 = dma.done.wait [#allocation4], 256  }
  0x2a   :  { %119 = vsyncadd [#allocation4], 4294967040 }
  0x2b   :  { %64 = vsyncpa [#allocation3], 1 }
  0x2c   :  { %65 = vsyncpa [#allocation4], 1 }

</bundles_post_ra>
